<compile_context>
chip_gen: v6e
topology: v6e:2x2x1
jax: 0.10.0
libtpu: 0.0.40
codegen_flags: <defaults>
</compile_context>

<pallas_src>
import jax
import jax.numpy as jnp
from jax.experimental import pallas as pl
from jax.experimental.pallas import tpu as pltpu


def _attn_kernel(g_ref, x_ref, wg_ref, wx_ref, bh_ref, wp_ref, bp_ref, out_ref):
    g = g_ref[...]                      # (Cg, TM)   channels x pixels
    x = x_ref[...]                      # (Cx, TM)

    # Fused 1x1 convs with folded BN: Wg^T @ g + Wx^T @ x + (bg + bx), f32 acc.
    h = jnp.dot(wg_ref[...], g, preferred_element_type=jnp.float32)
    h = h + jnp.dot(wx_ref[...], x, preferred_element_type=jnp.float32)
    h = jnp.maximum(h + bh_ref[...], 0.0)                 # relu, (F_int, TM) f32

    # psi 1x1 conv as a weighted sublane reduction (VPU multiply + XLU reduce)
    # instead of an M=1 MXU matmul; + folded BN bias from SMEM.
    p = jnp.sum(h * wp_ref[...], axis=0, keepdims=True) + bp_ref[0]
    psi = jax.nn.sigmoid(p)                               # (1, TM) f32, EUP

    # Gate: multiply in the compute dtype (bf16-native VALU on v6e/v7x),
    # broadcast psi over channels (sublanes); lane-dense store.
    out_ref[...] = (x * psi.astype(x.dtype)).astype(out_ref.dtype)


def _fold_bn(w, b, gamma, beta, mean, var, eps=1e-5):
    """Fold eval-mode BatchNorm into a preceding 1x1 conv.

    w: (C_in, C_out), b: (C_out,)  -> returns folded (w, b).
    """
    scale = gamma / jnp.sqrt(var + eps)                   # (C_out,)
    w_f = w * scale[None, :]
    b_f = b * scale + (beta - mean * scale)
    return w_f, b_f


def _vmem_budget():
    """Generation-aware (tile budget, vmem_limit_bytes)."""
    try:
        cap = pltpu.get_tpu_info().vmem_capacity_bytes
    except Exception:
        cap = 64 << 20                                    # conservative fallback
    if cap <= (64 << 20):                                 # v7x: 64 MiB per TC
        return 24 << 20, 48 << 20
    return 40 << 20, 80 << 20                             # v5e / v6e: 128 MiB


def _choose_lane_tile(hw, n, c_g, c_x, f_int, in_itemsize, out_itemsize,
                      budget_bytes):
    """Largest lane tile (multiple of 128, <= 32768) whose VMEM footprint --
    double-buffered g/x/out streams PLUS the live f32 intermediates (h, psi)
    -- fits the per-generation budget, then shrunk until the grid has enough
    parallel steps to feed both v7x TensorCores."""
    per_lane = (2 * (c_g + c_x) * in_itemsize      # g, x tiles (double buffered)
                + 2 * c_x * out_itemsize           # out tile   (double buffered)
                + (f_int + 2) * 4)                 # f32 h + psi intermediates
    t = int(budget_bytes // max(per_lane, 1))
    t = max(128, min(t, 32768))
    t -= t % 128
    if hw >= 128:
        # Keep the block no larger than the array; ragged tail is a partial
        # (masked) last block -- no HBM padding needed.
        t = min(t, (hw // 128) * 128)
    else:
        t = hw                                     # full-dim block is allowed

    def steps(tt):
        return n * (-(-hw // tt))

    # Megacore: keep >= ~8 grid steps so a big tile doesn't strand a core.
    while t > 128 and steps(t) < 8:
        t = max(128, (t // 2) // 128 * 128)
    return t


def attention_block(g, x, params, *, compute_dtype=jnp.bfloat16):
    """g: (N, F_l, H, W)  x: (N, F_g, H, W)  (matches the PyTorch forward).

    compute_dtype: dtype for the streamed activations / conv weights
    (default bf16: halves HBM traffic on this memory-bound kernel; matmul
    accumulation and softmax-free elementwise math stay f32).  Pass
    jnp.float32 (or None, meaning "input dtype") for exact f32 numerics.
    The returned array always has the ORIGINAL input dtype.
    """
    N, Cg, H, W = g.shape
    Nx, Cx, Hx, Wx_ = x.shape
    assert (N, H, W) == (Nx, Hx, Wx_)

    out_dtype = x.dtype                                   # before any casting
    if compute_dtype is None:
        compute_dtype = x.dtype
    compute_dtype = jnp.dtype(compute_dtype)

    # Fold eval-mode BN into the 1x1 convs; transpose weights to (C_out, C_in).
    wg, bg = _fold_bn(params["wg"], params["bg"], *params["bn_g"])
    wx, bx = _fold_bn(params["wx"], params["bx"], *params["bn_x"])
    wp, bp = _fold_bn(params["wp"], params["bp"], *params["bn_p"])
    f_int = wg.shape[1]

    wg_t = wg.T.astype(compute_dtype)                     # (F_int, Cg)
    wx_t = wx.T.astype(compute_dtype)                     # (F_int, Cx)
    wp_col = wp.astype(jnp.float32).reshape(f_int, 1)     # (F_int, 1), stays f32
    bh = (bg + bx).astype(jnp.float32).reshape(f_int, 1)  # fused bias for g1+x1
    bp1 = bp.astype(jnp.float32).reshape(1)               # scalar -> SMEM

    g = g.astype(compute_dtype)
    x = x.astype(compute_dtype)

    hw = H * W
    in_itemsize = compute_dtype.itemsize
    out_itemsize = jnp.dtype(out_dtype).itemsize
    budget, vmem_limit = _vmem_budget()
    tile = _choose_lane_tile(hw, N, Cg, Cx, f_int, in_itemsize, out_itemsize,
                             budget)

    # NCHW consumed directly: free contiguous reshape, no transposes, no pad.
    g3 = g.reshape(N, Cg, hw)
    x3 = x.reshape(N, Cx, hw)

    grid = (N, pl.cdiv(hw, tile))
    full2d = lambda r, c: pl.BlockSpec((r, c), lambda n, j: (0, 0))

    out3 = pl.pallas_call(
        _attn_kernel,
        out_shape=jax.ShapeDtypeStruct((N, Cx, hw), out_dtype),
        grid_spec=pltpu.PrefetchScalarGridSpec(
            num_scalar_prefetch=0,
            grid=grid,
            in_specs=[
                pl.BlockSpec((None, Cg, tile), lambda n, j: (n, 0, j)),   # g
                pl.BlockSpec((None, Cx, tile), lambda n, j: (n, 0, j)),   # x
                full2d(f_int, Cg),                                        # Wg^T
                full2d(f_int, Cx),                                        # Wx^T
                full2d(f_int, 1),                                         # bg+bx
                full2d(f_int, 1),                                         # wp col
                pl.BlockSpec(memory_space=pltpu.MemorySpace.SMEM),        # bp
            ],
            out_specs=pl.BlockSpec((None, Cx, tile), lambda n, j: (n, 0, j)),
        ),
        compiler_params=pltpu.CompilerParams(
            dimension_semantics=("parallel", "parallel"),
            vmem_limit_bytes=vmem_limit),
    )(g3, x3, wg_t, wx_t, bh, wp_col, bp1)

    return out3.reshape(N, Cx, H, W)


def make_params(key, F_g, F_l, F_int):
    """Deterministic parameters matching Attention_block.__init__ shapes."""
    F_int = F_int // 2   # matches `F_int //= 2` in the PyTorch module
    ks = jax.random.split(key, 6)
    p = {
        # conv weights stored as (C_in, C_out); kernel uses the transpose
        "wg": jax.random.normal(ks[0], (F_l, F_int), jnp.float32) * 0.2,
        "bg": jax.random.normal(ks[1], (F_int,), jnp.float32) * 0.1,
        "wx": jax.random.normal(ks[2], (F_g, F_int), jnp.float32) * 0.2,
        "bx": jax.random.normal(ks[3], (F_int,), jnp.float32) * 0.1,
        "wp": jax.random.normal(ks[4], (F_int, 1), jnp.float32) * 0.2,
        "bp": jax.random.normal(ks[5], (1,), jnp.float32) * 0.1,
        # BatchNorm (gamma, beta, running_mean, running_var), eval mode
        "bn_g": (jnp.ones((F_int,)) * 1.1, jnp.ones((F_int,)) * 0.05,
                 jnp.ones((F_int,)) * 0.02, jnp.ones((F_int,)) * 0.9),
        "bn_x": (jnp.ones((F_int,)) * 0.9, jnp.ones((F_int,)) * -0.03,
                 jnp.ones((F_int,)) * -0.01, jnp.ones((F_int,)) * 1.1),
        "bn_p": (jnp.ones((1,)) * 1.05, jnp.ones((1,)) * 0.01,
                 jnp.ones((1,)) * 0.0, jnp.ones((1,)) * 1.0),
    }
    return p


def reference(g, x, params):
    """Pure-JAX reference of the same eval-mode forward (NCHW in/out)."""
    wg, bg = _fold_bn(params["wg"], params["bg"], *params["bn_g"])
    wx, bx = _fold_bn(params["wx"], params["bx"], *params["bn_x"])
    wp, bp = _fold_bn(params["wp"], params["bp"], *params["bn_p"])
    g2 = jnp.transpose(g, (0, 2, 3, 1)).astype(jnp.float32)
    x2 = jnp.transpose(x, (0, 2, 3, 1)).astype(jnp.float32)
    g1 = g2 @ wg + bg
    x1 = x2 @ wx + bx
    h = jnp.maximum(g1 + x1, 0.0)
    psi = jax.nn.sigmoid(h @ wp + bp)
    out = x2 * psi
    return jnp.transpose(out, (0, 3, 1, 2))


if __name__ == "__main__":
    key = jax.random.PRNGKey(0)

    # Case 1: N=2, F_g=F_l=4, F_int=8 (halved to 4 inside the module), H=W=16.
    N, F_g, F_l, F_int, Hs, Ws = 2, 4, 4, 8, 16, 16
    kg, kx, kp = jax.random.split(key, 3)
    g = jax.random.normal(kg, (N, F_l, Hs, Ws), jnp.float32)
    x = jax.random.normal(kx, (N, F_g, Hs, Ws), jnp.float32)
    params = make_params(kp, F_g, F_l, F_int)
    ref = reference(g, x, params)

    # 1a) exact f32 path: strict check.
    out_f32 = jax.block_until_ready(
        attention_block(g, x, params, compute_dtype=jnp.float32))
    assert out_f32.shape == x.shape and out_f32.dtype == x.dtype
    assert jnp.allclose(out_f32, ref, atol=1e-5, rtol=1e-5)

    # 1b) default (recommended) bf16 compute path: output dtype stays f32.
    out_def = jax.block_until_ready(attention_block(g, x, params))
    assert out_def.dtype == x.dtype
    assert jnp.allclose(out_def, ref, atol=0.1, rtol=0.1)

    # 1c) fully-bf16 inputs (no wrapper cast, bf16 output).
    out_bf = jax.block_until_ready(
        attention_block(g.astype(jnp.bfloat16), x.astype(jnp.bfloat16), params))
    assert out_bf.dtype == jnp.bfloat16
    assert jnp.allclose(out_bf.astype(jnp.float32), ref, atol=0.1, rtol=0.1)

    # Case 2: distinct F_g/F_l and H*W not a multiple of 128 -- exercises the
    # pad-free partial-last-block (masked write) path.
    N2, F_g2, F_l2, F_int2, H2, W2 = 1, 8, 4, 16, 20, 20
    k2g, k2x, k2p = jax.random.split(jax.random.PRNGKey(1), 3)
    g2 = jax.random.normal(k2g, (N2, F_l2, H2, W2), jnp.float32)
    x2 = jax.random.normal(k2x, (N2, F_g2, H2, W2), jnp.float32)
    params2 = make_params(k2p, F_g2, F_l2, F_int2)
    out2 = jax.block_until_ready(
        attention_block(g2, x2, params2, compute_dtype=jnp.float32))
    ref2 = reference(g2, x2, params2)
    assert jnp.allclose(out2, ref2, atol=1e-5, rtol=1e-5)

    print("KERNEL_OK")
</pallas_src>

<mosaic_0001>
module attributes {stable_mosaic.version = 11 : i64} {
  func.func @_attn_kernel(%arg0: i32, %arg1: i32, %arg2: memref<1x4x128xf32, #tpu.memory_space<vmem>>, %arg3: memref<1x4x128xf32, #tpu.memory_space<vmem>>, %arg4: memref<4x4xf32, #tpu.memory_space<vmem>>, %arg5: memref<4x4xf32, #tpu.memory_space<vmem>>, %arg6: memref<4x1xf32, #tpu.memory_space<vmem>>, %arg7: memref<4x1xf32, #tpu.memory_space<vmem>>, %arg8: memref<1xf32, #tpu.memory_space<smem>>, %arg9: memref<1x4x128xf32, #tpu.memory_space<vmem>>) attributes {dimension_semantics = [#tpu.dimension_semantics<parallel>, #tpu.dimension_semantics<parallel>], iteration_bounds = array<i64: 2, 2>, scalar_prefetch = 0 : i64, scratch_operands = 0 : i64, tpu.core_type = #tpu.core_type<tc>, window_params = [{transform_indices = @transform_0, window_bounds = array<i64: 1, 4, 128>}, {transform_indices = @transform_1, window_bounds = array<i64: 1, 4, 128>}, {pipeline_mode = #tpu.pipeline_mode<synchronous>, transform_indices = @transform_2, window_bounds = array<i64: 4, 4>}, {pipeline_mode = #tpu.pipeline_mode<synchronous>, transform_indices = @transform_3, window_bounds = array<i64: 4, 4>}, {pipeline_mode = #tpu.pipeline_mode<synchronous>, transform_indices = @transform_4, window_bounds = array<i64: 4, 1>}, {pipeline_mode = #tpu.pipeline_mode<synchronous>, transform_indices = @transform_5, window_bounds = array<i64: 4, 1>}, {transform_indices = @transform_6, window_bounds = array<i64: 1>}, {transform_indices = @transform_7, window_bounds = array<i64: 1, 4, 128>}]} {
    %c0 = arith.constant 0 : index
    %c0_0 = arith.constant 0 : index
    %c0_1 = arith.constant 0 : index
    %0 = vector.load %arg2[%c0, %c0_0, %c0_1] : memref<1x4x128xf32, #tpu.memory_space<vmem>>, vector<1x4x128xf32>
    %1 = vector.shape_cast %0 : vector<1x4x128xf32> to vector<4x128xf32>
    %c0_2 = arith.constant 0 : index
    %c0_3 = arith.constant 0 : index
    %c0_4 = arith.constant 0 : index
    %2 = vector.load %arg3[%c0_2, %c0_3, %c0_4] : memref<1x4x128xf32, #tpu.memory_space<vmem>>, vector<1x4x128xf32>
    %3 = vector.shape_cast %2 : vector<1x4x128xf32> to vector<4x128xf32>
    %c0_5 = arith.constant 0 : index
    %c0_6 = arith.constant 0 : index
    %4 = vector.load %arg4[%c0_5, %c0_6] : memref<4x4xf32, #tpu.memory_space<vmem>>, vector<4x4xf32>
    %cst = arith.constant dense<0.000000e+00> : vector<4x128xf32>
    %5 = tpu.matmul %4, %1, %cst {dimension_numbers = #tpu.dot_dimension_numbers<[1], [0], [0], [1], [0, 0, 1, 1], [], []>} : vector<4x4xf32>, vector<4x128xf32>, vector<4x128xf32> -> vector<4x128xf32>
    %c0_7 = arith.constant 0 : index
    %c0_8 = arith.constant 0 : index
    %6 = vector.load %arg5[%c0_7, %c0_8] : memref<4x4xf32, #tpu.memory_space<vmem>>, vector<4x4xf32>
    %cst_9 = arith.constant dense<0.000000e+00> : vector<4x128xf32>
    %7 = tpu.matmul %6, %3, %cst_9 {dimension_numbers = #tpu.dot_dimension_numbers<[1], [0], [0], [1], [0, 0, 1, 1], [], []>} : vector<4x4xf32>, vector<4x128xf32>, vector<4x128xf32> -> vector<4x128xf32>
    %8 = arith.addf %5, %7 : vector<4x128xf32>
    %c0_10 = arith.constant 0 : index
    %c0_11 = arith.constant 0 : index
    %9 = vector.load %arg6[%c0_10, %c0_11] : memref<4x1xf32, #tpu.memory_space<vmem>>, vector<4x1xf32>
    %10 = vector.broadcast %9 : vector<4x1xf32> to vector<4x128xf32>
    %11 = arith.addf %8, %10 : vector<4x128xf32>
    %cst_12 = arith.constant 0.000000e+00 : f32
    %12 = vector.broadcast %cst_12 : f32 to vector<4x128xf32>
    %13 = arith.maximumf %11, %12 : vector<4x128xf32>
    %c0_13 = arith.constant 0 : index
    %c0_14 = arith.constant 0 : index
    %14 = vector.load %arg7[%c0_13, %c0_14] : memref<4x1xf32, #tpu.memory_space<vmem>>, vector<4x1xf32>
    %15 = vector.broadcast %14 : vector<4x1xf32> to vector<4x128xf32>
    %16 = arith.mulf %13, %15 : vector<4x128xf32>
    %cst_15 = arith.constant dense<0.000000e+00> : vector<128xf32>
    %17 = vector.multi_reduction <add>, %16, %cst_15 [0] : vector<4x128xf32> to vector<128xf32>
    %18 = vector.shape_cast %17 : vector<128xf32> to vector<1x128xf32>
    %c0_16 = arith.constant 0 : index
    %19 = memref.load %arg8[%c0_16] : memref<1xf32, #tpu.memory_space<smem>>
    %20 = vector.broadcast %19 : f32 to vector<1x128xf32>
    %21 = arith.addf %18, %20 : vector<1x128xf32>
    %22 = arith.negf %21 : vector<1x128xf32>
    %23 = math.exp %22 : vector<1x128xf32>
    %cst_17 = arith.constant 1.000000e+00 : f32
    %24 = vector.broadcast %cst_17 : f32 to vector<1x128xf32>
    %25 = arith.addf %24, %23 : vector<1x128xf32>
    %26 = arith.divf %24, %25 : vector<1x128xf32>
    %27 = vector.broadcast %26 : vector<1x128xf32> to vector<4x128xf32>
    %28 = arith.mulf %3, %27 : vector<4x128xf32>
    %c0_18 = arith.constant 0 : index
    %c0_19 = arith.constant 0 : index
    %c0_20 = arith.constant 0 : index
    %29 = vector.load %arg9[%c0_18, %c0_19, %c0_20] : memref<1x4x128xf32, #tpu.memory_space<vmem>>, vector<1x4x128xf32>
    %30 = vector.shape_cast %29 : vector<1x4x128xf32> to vector<4x128xf32>
    %31 = vector.shape_cast %28 : vector<4x128xf32> to vector<1x4x128xf32>
    tpu.vector_store %arg9[%c0_18, %c0_19, %c0_20], %31 {strides = array<i32>} : memref<1x4x128xf32, #tpu.memory_space<vmem>>, vector<1x4x128xf32>,
    return
  }
  func.func @transform_0(%arg0: i32, %arg1: i32) -> (i32, i32, i32) {
    %c0_i32 = arith.constant 0 : i32
    %c0_i32_0 = arith.constant 0 : i32
    return %arg0, %c0_i32, %arg1 : i32, i32, i32
  }
  func.func @transform_1(%arg0: i32, %arg1: i32) -> (i32, i32, i32) {
    %c0_i32 = arith.constant 0 : i32
    %c0_i32_0 = arith.constant 0 : i32
    return %arg0, %c0_i32, %arg1 : i32, i32, i32
  }
  func.func @transform_2(%arg0: i32, %arg1: i32) -> (i32, i32) {
    %c0_i32 = arith.constant 0 : i32
    %c0_i32_0 = arith.constant 0 : i32
    %c0_i32_1 = arith.constant 0 : i32
    return %c0_i32, %c0_i32_0 : i32, i32
  }
  func.func @transform_3(%arg0: i32, %arg1: i32) -> (i32, i32) {
    %c0_i32 = arith.constant 0 : i32
    %c0_i32_0 = arith.constant 0 : i32
    %c0_i32_1 = arith.constant 0 : i32
    return %c0_i32, %c0_i32_0 : i32, i32
  }
  func.func @transform_4(%arg0: i32, %arg1: i32) -> (i32, i32) {
    %c0_i32 = arith.constant 0 : i32
    %c0_i32_0 = arith.constant 0 : i32
    %c0_i32_1 = arith.constant 0 : i32
    return %c0_i32, %c0_i32_0 : i32, i32
  }
  func.func @transform_5(%arg0: i32, %arg1: i32) -> (i32, i32) {
    %c0_i32 = arith.constant 0 : i32
    %c0_i32_0 = arith.constant 0 : i32
    %c0_i32_1 = arith.constant 0 : i32
    return %c0_i32, %c0_i32_0 : i32, i32
  }
  func.func @transform_6(%arg0: i32, %arg1: i32) -> i32 {
    %c0_i32 = arith.constant 0 : i32
    %c0_i32_0 = arith.constant 0 : i32
    return %c0_i32 : i32
  }
  func.func @transform_7(%arg0: i32, %arg1: i32) -> (i32, i32, i32) {
    %c0_i32 = arith.constant 0 : i32
    %c0_i32_0 = arith.constant 0 : i32
    return %arg0, %c0_i32, %arg1 : i32, i32, i32
  }
}

</mosaic_0001>

<bundles_post_ra>
// kernel: tpu_custom_call.1
= control target key start
LH: loop header
LB: loop body
LE: loop exit
PB: predicated region body
PF: predicated region fallthrough
CT: control target
= control target key end

     0   :  { %s1214_s0 = inlined_call_operand.hbm [shape: f32[2,4,256], index: 0, kind: input, shape index: {}]   ;;  %s1215_s1 = inlined_call_operand.hbm [shape: f32[2,4,256], index: 1, kind: input, shape index: {}]   ;;  %s1216_s2 = inlined_call_operand.vmem [shape: f32[4,4], index: 2, kind: input, shape index: {}]   ;;  %s1217_s3 = inlined_call_operand.vmem [shape: f32[4,4], index: 3, kind: input, shape index: {}]   ;;  %s1218_s4 = inlined_call_operand.vmem [shape: f32[4,1], index: 4, kind: input, shape index: {}]   ;;  %s1219_s5 = inlined_call_operand.vmem [shape: f32[4,1], index: 5, kind: input, shape index: {}]   ;;  %s1220_s6 = inlined_call_operand.<no memory space> [shape: f32[1], index: 6, kind: input, shape index: {}]   ;;  %s1221_s7 = inlined_call_operand.hbm [shape: f32[2,4,256], index: 7, kind: output, shape index: {}]  }
   0x1   :  { %1226 = sst [smem:[#allocation16_spill]] %s1214_s0 }
   0x2   :  { %12 = sst [smem:[#allocation2]] %s1220_s6 }
   0x3   :  { %13 = vsyncpa [#allocation4], 0 }
   0x4   :  { %15 = vsyncpa [#allocation4 + $0x1], 0 }
   0x5   :  { %16 = vsyncpa [#allocation7], 0 }
   0x6   :  { %18 = vsyncpa [#allocation7 + $0x1], 0 }
   0x7   :  { %19 = vsyncpa [#allocation5], 0 }
   0x8   :  { %21 = vsyncpa [#allocation5 + $0x1], 0  ;;  %s1007_s26 = smov 0   ;;  %s1009_s27 = smov 0  }
   0x9   :  { %s1011_s28 = smov 0   ;;  %s1013_s29 = smov 0  }
   0xa   :  { %s1015_s30 = smov 0   ;;  %s1017_s8 = smov 0  }
   0xb   :  { %s1019_s9 = smov 0   ;;  %s1021_s6 = smov 0  }
   0xc LB: > { %1227 = sst [smem:[#allocation12_spill]] %s952_s9  ;;  %s671_s10 = sadd.s32 4294967295, %s956_s6   ;;  %s956_s6 = sphi %s1021_s6, %s27_s6   ;;  %s952_s9 = sphi %s1019_s9, %s1241_s9   ;;  %s948_s8 = sphi %s1017_s8, %s1246_s8   ;;  %s944_s30 = sphi %s1015_s30, %s1239_s30   ;;  %s940_s29 = sphi %s1013_s29, %s1245_s29   ;;  %s936_s28 = sphi %s1011_s28, %s1244_s28   ;;  %s932_s27 = sphi %s1009_s27, %s1243_s27   ;;  %s928_s26 = sphi %s1007_s26, %s1242_s26  }
   0xd   : > { %s672_s11 = sadd.s32 4294967294, %s956_s6   ;;  %s36_s12 = sadd.s32 1, %s948_s8 }
   0xe   : > { %s39_s13 = sadd.s32 1, %s952_s9  ;;  %p37_p0 = scmp.ge.s32.totalorder %s36_s12, 2 }
   0xf   : > { %s48_s14 = sadd.s32 1, %s936_s28  ;;  %p55_p1 = scmp.ne.s32.totalorder %s936_s28, %s932_s27 }
  0x10   : > { %p56_p2 = scmp.eq.s32.totalorder %s956_s6, 0  ;;  %s1248_s12 = smov (%p37_p0, %s36_s12), 0 }
  0x11   : > { %1228 = sst [smem:[#allocation13_spill]] %s1248_s12  ;;  %s1250_s13 = smov (!%p37_p0, %s39_s13), %s952_s9 }
  0x12   : > { %s44_s15 = ssub.s32 %s948_s8, %s1248_s12  ;;  %p1060_p3 = por %p56_p2, %p55_p1 }
  0x13   : > { %p41_p4 = scmp.ge.s32.totalorder %s1250_s13, 2  ;;  %p61_p5 = scmp.ne.s32.totalorder %s932_s27, %s928_s26 }
  0x14   : > { %p62_p6 = scmp.eq.s32.totalorder %s671_s10, 0  ;;  %p220_p7 = scmp.eq.s32.totalorder %s671_s10, 3 }
  0x15   : > { %s1252_s13 = smov (%p41_p4, %s1250_s13), 0  ;;  %p226_p10 = scmp.eq.s32.totalorder %s672_s11, 3 }
  0x16   : > { %1230 = sst [smem:[#allocation14_spill]] %s1252_s13  ;;  %p1068_p8 = por %p62_p6, %p61_p5 }
  0x17   : > { %p1072_p9 = por %p220_p7, %p55_p1  ;;  %s43_s19 = ssub.s32 %s952_s9, %s1252_s13 }
  0x18   : > { %s45_s20 = sor.u32 %s44_s15, %s43_s19  ;;  %p1078_p12 = por %p226_p10, %p61_p5 }
  0x19   : > { %p46_p11 = scmp.eq.s32.totalorder %s45_s20, 0  ;;  %p726_p13 = scmp.lt.s32.totalorder %s956_s6, 4 }
  0x1a   : > { %s1233_s21 = scalar_select %p1078_p12, 1, 0 }
  0x1b   : > { %s1084_s22 = sand.u32 1, %s936_s28   ;;  %s676_s25 = sshll.u32 %s952_s9, 1 }
  0x1c   : > { %1234 = sst [smem:[#allocation15_spill]] %s1233_s21  ;;  %s675_s24 = sshll.u32 %s1084_s22, 2 }
  0x1d   : > { %s1087_s23 = scalar_select %p46_p11, %s936_s28, %s48_s14  }
  0x1e   : > { %s270_s10 = sadd.s32 %s948_s8, %s676_s25  ;;  %s265_s11 = scalar_lea.vmem [#allocation3], %s675_s24 }
  0x1f   : > { %s274_s15 = sshll.u32 %s265_s11, 4  ;;  %s677_s19 = sshll.u32 %s270_s10, 6  ;;  %s275_s15 = int_to_ptr.vmem [resolvable:$true] %s274_s15 }
  0x20   : > { %s1235_s0 = sld [smem:[#allocation16_spill]]  ;;  %p1099_p0 = pnand %p726_p13, %p1060_p3 }
  0x21   : > { %p681_p1 = scmp.ge.s32.totalorder %s956_s6, 1  ;;  %p299_p2 = scmp.lt.s32.totalorder %s956_s6, 5 }
  0x22   : > { %s262_s14 = scalar_lea.sflag [#allocation4], %s1084_s22  ;;  %p802_p4 = pneg %p1099_p0 }
  0x23   : > { %s813_s25 = scalar_lea.vmem %s275_s15, 64  ;;  %s958_s13 = smov [#allocation3]  }
  0x24   : > { %p814_p5 = scmp.ne.s32.totalorder %s275_s15, %s813_s25  ;;  %s818_s10 = sshll.u32 %s958_s13, 4  ;;  %s819_s10 = int_to_ptr.vmem [resolvable:$false] %s818_s10 }
  0x25   : > { %s820_s16 = scalar_lea.vmem %s819_s10, 128  ;;  %p821_p3 = scmp.lt.s32.totalorder %s275_s15, %s819_s10 }
  0x26   : > { %s272_s12 = scalar_lea.hbm %s1235_s0, %s677_s19  ;;  %p816_p6 = pnand %p814_p5, %p802_p4 }
  0x27   : > { %p822_p10 = scmp.lt.s32.totalorder %s820_s16, %s813_s25 }
  0x28   : > { %p817_p7 = pneg %p816_p6 }
  0x29   : > { %p823_p11 = por %p822_p10, %p821_p3 }
  0x2b   : > { %p824_p13 = pnand %p823_p11, %p817_p7 }
  0x2d   : > { %827 = shalt.err (!%p824_p13)
}
  0x2e   : > { %718 = dma.hbm_to_vmem [thread:$0]  (!%p1099_p0), %s272_s12, 64, %s275_s15, %s262_s14  }
  0x2f   : > { %p1117_p5 = pnand %p681_p1, %p299_p2  ;;  %s292_s25 = scalar_lea.hbm %s1215_s1, %s677_s19 }
  0x30   : > { %s285_s10 = scalar_lea.vmem [#allocation6], %s675_s24  ;;  %s282_s0 = scalar_lea.sflag [#allocation7], %s1084_s22 }
  0x31   : > { %s294_s16 = sshll.u32 %s285_s10, 4  ;;  %s959_s12 = smov [#allocation6]   ;;  %s295_s16 = int_to_ptr.vmem [resolvable:$true] %s294_s16 }
  0x32   : > { %s841_s9 = scalar_lea.vmem %s295_s16, 64  ;;  %s846_s15 = sshll.u32 %s959_s12, 4  ;;  %s847_s15 = int_to_ptr.vmem [resolvable:$false] %s846_s15 }
  0x33   : > { %p842_p6 = scmp.ne.s32.totalorder %s295_s16, %s841_s9  ;;  %s848_s14 = scalar_lea.vmem %s847_s15, 128 }
  0x34   : > { %p849_p1 = scmp.lt.s32.totalorder %s295_s16, %s847_s15  ;;  %p850_p2 = scmp.lt.s32.totalorder %s848_s14, %s841_s9 }
  0x35   : > { %p844_p7 = pnand %p842_p6, %p802_p4 }
  0x36   : > { %p851_p10 = por %p850_p2, %p849_p1 }
  0x37   : > { %p845_p3 = pneg %p844_p7 }
  0x39   : > { %p852_p11 = pnand %p851_p10, %p845_p3 }
  0x3b   : > { %855 = shalt.err (!%p852_p11)
}
  0x3c   : > { %721 = dma.hbm_to_vmem [thread:$0]  (!%p1099_p0), %s292_s25, 64, %s295_s16, %s282_s0  }
  0x3d   : > { %303 = sbr.rel (%p1117_p5) target bundleno = 337 (0x151), region = 48  ;;  %s1135_s22 = sand.u32 (!%p1117_p5), 1, %s932_s27  }
  0x3e   : > { %s1138_s24 = sshll.u32 (!%p1117_p5), %s1135_s22, 2  ;;  %s306_s19 = scalar_lea.sflag (!%p1117_p5), [#allocation4], %s1135_s22 }
  0x3f   : > { %s309_s9 = scalar_lea.vmem (!%p1117_p5), [#allocation3], %s1138_s24 }
  0x42   : > { %915 = dma.done.wait (%p1068_p8), %s306_s19, 64  }
  0x43   : > { %917 = vsyncadd (%p1068_p8), %s306_s19, 4294967232  ;;  %s315_s0 = scalar_lea.sflag [#allocation7], %s1135_s22  ;;  %s318_s21 = scalar_lea.vmem [#allocation6], %s1138_s24 }
  0x44   : > { %919 = dma.done.wait (%p1068_p8), %s315_s0, 64  }
  0x45   : > { %921 = vsyncadd (%p1068_p8), %s315_s0, 4294967232  ;;  %v960_v0 = vmov 0.0   ;;  %vm961_vm0 = vmmov 0   ;;  %v962_v1 = vmov 0   ;;  %vm362_vm1 = vcmask 1043456   ;;  %s534_s15 = sld [smem:[#allocation2]] }
  0x46   : > { %699 = vmatprep.subr.mxu0 %v960_v0  ;;  %704 = vmatprep.subr.mxu1 %v960_v0  ;;  %vm358_vm2 = vcmask 31744   ;;  %v355_v2 = vld [vmem:[%s318_s21] sm:$0xf]  ;;  %v354_v3 = vld [vmem:[%s309_s9] sm:$0xf]  ;;  %s691_s14 = sshll.u32 %s944_s30, 1 }
  0x47   : > { %701 = vmatprep.mubr.msk.f32.mxu0 %vm961_vm0, %v960_v0  ;;  %706 = vmatprep.mubr.msk.f32.mxu1 %vm961_vm0, %v960_v0  ;;  %v357_v4 = vld [vmem:[%s1217_s3] sm:$0xf]  ;;  %s557_s19 = sadd.s32 %s940_s29, %s691_s14  ;;  %s353_s0 = scalar_lea.vmem [#allocation8], %s1138_s24 }
  0x48   : > { %795 = vset.pattern.permute.xlu0 %v962_v1  ;;  %700 = vmatpush3.msk.msra.mxu0 %vm362_vm1, %v355_v2  ;;  %v356_v5 = vld [vmem:[%s1216_s2] sm:$0xf]  ;;  %s692_s9 = sshll.u32 %s557_s19, 6  ;;  %s561_s21 = sshll.u32 %s353_s0, 4  ;;  %s562_s21 = int_to_ptr.vmem [resolvable:$true] %s561_s21 }
  0x49   : > { %705 = vmatpush3.msk.msra.mxu1 %vm362_vm1, %v354_v3  ;;  %v512_v6 = vld [vmem:[%s1218_s4] sm:$0xf]  ;;  %702 = vmatmul.mubr.msk.f32.vlgmr.msra.gmra.mxu0 %vm358_vm2, %v357_v4  ;;  %s559_s17 = scalar_lea.hbm %s1221_s7, %s692_s9  ;;  %s546_s13 = scalar_lea.sflag [#allocation5], %s1135_s22 }
  0x4a   : > { %707 = vmatmul.mubr.msk.f32.vlgmr.msra.gmra.mxu1 %vm358_vm2, %v356_v5  ;;  %515 = vperm.xlu0 %795, %v512_v6   ;;  %v520_v7 = vld [vmem:[%s1219_s5] sm:$0xf]  ;;  %s856_s25 = scalar_lea.vmem %s562_s21, 64  ;;  %s963_s10 = smov [#allocation8]  }
  0x4b   : > { %v535_v24 = vstv %s534_s15  ;;  %p857_p8 = scmp.ne.s32.totalorder %s562_s21, %s856_s25  ;;  %s860_s30 = sshll.u32 %s963_s10, 4  ;;  %s861_s30 = int_to_ptr.vmem [resolvable:$false] %s860_s30 }
  0x4c   : > { %s862_s29 = scalar_lea.vmem %s861_s30, 128  ;;  %p863_p13 = scmp.lt.s32.totalorder %s562_s21, %s861_s30 }
  0x4d   : > { %p858_p0 = pnand %p857_p8, %p1072_p9  ;;  %p864_p5 = scmp.lt.s32.totalorder %s862_s29, %s856_s25 }
  0x4e   : > { %523 = vperm.xlu0 %795, %v520_v7  }
  0x4f   : > { %p859_p4 = pneg %p858_p0  ;;  %p865_p6 = por %p864_p5, %p863_p13 }
  0x51   : > { %p866_p7 = pnand %p865_p6, %p859_p4 }
  0xc5   : > { %v516_v8 = vpop.permute.xlu0 %515 }
  0xc9   : > { %v524_v16 = vpop.permute.xlu0 %523 }
 0x109   : > { %v432_v9 = vpop.f32.mrf.mxu0 }
 0x10a   : > { %v508_v10 = vpop.f32.mrf.mxu1 }
 0x10b   : > { %v509_v11 = vadd.f32 %v508_v10, %v432_v9  ;;  %v703_v12 = vpop.f32.mrf.mxu0 }
 0x10c   : > { %v708_v13 = vpop.f32.mrf.mxu1 }
 0x10d   : > { %v518_v14 = vadd.f32 %v516_v8, %v509_v11 }
 0x10f   : > { %v519_v15 = vmax.f32 %v518_v14, 0.0 }
 0x111   : > { %v526_v17 = vmul.f32 %v524_v16, %v519_v15 }
 0x113   : > { %v527_v18 = vsel %vm362_vm1, %v526_v17, 0.0 }
 0x114   : > { %v528_v19 = vrot.slane %v527_v18, 4 }
 0x116   : > { %v529_v20 = vadd.f32 %v528_v19, %v527_v18 }
 0x118   : > { %v530_v21 = vrot.slane %v529_v20, 2 }
 0x11a   : > { %v531_v22 = vadd.f32 %v530_v21, %v529_v20 }
 0x11c   : > { %v532_v23 = vrot.slane %v531_v22, 1 }
 0x11e   : > { %v533_v25 = vadd.f32 %v532_v23, %v531_v22 }
 0x120   : > { %v536_v26 = vadd.f32 %v535_v24, %v533_v25 }
 0x122   : > { %v689_v27 = vmul.f32 -1.442695, %v536_v26 }
 0x124   : > { %796 = vpow2.f32 %v689_v27 }
 0x131   : > { %v797_v28 = vpop.eup %796 }
 0x132   : > { %v540_v29 = vadd.f32 1.0, %v797_v28 }
 0x134   : > { %798 = vrcp.f32 %v540_v29 }
 0x141   : > { %v799_v30 = vpop.eup %798 }
 0x142   : > { %v543_v31 = vmul.f32 %v799_v30, %v355_v2 }
 0x144   : > { %544 = vst [vmem:[%s353_s0] sm:$0xf] %v543_v31 }
 0x145   : > { %869 = shalt.err (!%p866_p7)
}
 0x146   : > { %s870_s24 = scalar_lea.hbm %s559_s17, 64  ;;  %s874_s12 = scalar_lea.hbm %s1221_s7, 256 }
 0x147   : > { %p871_p3 = scmp.ne.s32.totalorder %s559_s17, %s870_s24  ;;  %p875_p10 = scmp.lt.s32.totalorder %s559_s17, %s1221_s7 }
 0x148   : > { %p876_p11 = scmp.lt.s32.totalorder %s874_s12, %s870_s24 }
 0x149   : > { %p872_p1 = pnand %p871_p3, %p1072_p9 }
 0x14a   : > { %p877_p8 = por %p876_p11, %p875_p10 }
 0x14b   : > { %p873_p2 = pneg %p872_p1 }
 0x14d   : > { %p878_p0 = pnand %p877_p8, %p873_p2 }
 0x14f   : > { %881 = shalt.err (!%p878_p0)
}
 0x150   : > { %713 = dma.vmem_to_hbm [thread:$0]  (%p1072_p9), %s562_s21, 64, %s559_s17, %s546_s13  }
 0x151 PF: > { %p727_p4 = scmp.ge.s32.totalorder %s956_s6, 2  ;;  %s573_s9 = sand.u32 1, %s928_s26  }
 0x152   : > { %s574_s0 = scalar_lea.sflag [#allocation5], %s573_s9 }
 0x153   : > { %p723_p13 = pnand %p727_p4, %p1078_p12 }
 0x155   : > { %p724_p5 = pneg %p723_p13 }
 0x157   : > { %923 = dma.done.wait (%p724_p5), %s574_s0, 64  }
 0x158   : > { %925 = vsyncadd (%p724_p5), %s574_s0, 4294967232  ;;  %s27_s6 = sadd.s32 1, %s956_s6   ;;  %s1239_s30 = sld [smem:[#allocation12_spill]] }
 0x159   : > { %p24_p6 = scmp.ge.s32.totalorder %s27_s6, 6   ;;  %s1240_s18 = sld [smem:[#allocation13_spill]] }
 0x15a   : > { %s1241_s9 = sld [smem:[#allocation14_spill]]  ;;  %s1242_s26 = smov %s932_s27 }
 0x15b   : > { %s1243_s27 = smov %s936_s28  ;;  %s1244_s28 = smov %s1087_s23 }
 0x15c   : > { %s1245_s29 = smov %s948_s8  ;;  %26 = sbr.rel (!%p24_p6) target bundleno = 12 (0xc), region = 106 }
 0x15f   : > { %s1246_s8 = smov %s1240_s18 }
 0x161   :  { %579 = vsyncpa [#allocation4], 1 }
 0x162   :  { %581 = vsyncpa [#allocation4 + $0x1], 1 }
 0x163   :  { %582 = vsyncpa [#allocation7], 1 }
 0x164   :  { %584 = vsyncpa [#allocation7 + $0x1], 1 }
 0x165   :  { %585 = vsyncpa [#allocation5], 1 }
 0x166   :  { %587 = vsyncpa [#allocation5 + $0x1], 1 }

</bundles_post_ra>
